<compile_context>
chip_gen: v7x
topology: tpu7x:2x2x1
jax: 0.10.0
libtpu: 0.0.40
codegen_flags: <defaults>
</compile_context>

<pallas_src>
import functools

import jax
import jax.numpy as jnp
from jax.experimental import pallas as pl
from jax.experimental.pallas import tpu as pltpu

NEG_SLOPE = 0.2      # GATv2Conv default negative_slope
LANE = 128           # lane width / feature padding
TILE_T = 128         # target-node tile (parallel axis)
TILE_S = 128         # source-node tile (reduction axis)
TILE_N = 128         # node tile for the projection kernel
NEG_BIG = -1e30


def _round_up(x, m):
    return (x + m - 1) // m * m


def _pad2(a, rows, cols):
    out = jnp.zeros((rows, cols), a.dtype)
    return out.at[: a.shape[0], : a.shape[1]].set(a)


# --------------------------------------------------------------------------- #
# Projection kernel: gl = x @ Wl + bl, gr = x @ Wr + br  (computed once/layer) #
# --------------------------------------------------------------------------- #
def _project_kernel(x_ref, wl_ref, bl_ref, wr_ref, br_ref, gl_ref, gr_ref):
    x = x_ref[...].astype(jnp.bfloat16)            # bf16 MXU operands
    gl_ref[...] = (jnp.dot(x, wl_ref[...], preferred_element_type=jnp.float32)
                   + bl_ref[...])
    gr_ref[...] = (jnp.dot(x, wr_ref[...], preferred_element_type=jnp.float32)
                   + br_ref[...])


def gatv2_project(x, wl, bl, wr, br):
    npad, fp = x.shape
    cp = wl.shape[1]
    return pl.pallas_call(
        _project_kernel,
        out_shape=(jax.ShapeDtypeStruct((npad, cp), jnp.float32),
                   jax.ShapeDtypeStruct((npad, cp), jnp.float32)),
        grid_spec=pltpu.PrefetchScalarGridSpec(
            num_scalar_prefetch=0,
            grid=(npad // TILE_N,),
            in_specs=[
                pl.BlockSpec((TILE_N, fp), lambda i: (i, 0)),   # x tile
                pl.BlockSpec((fp, cp), lambda i: (0, 0)),       # Wl (bf16)
                pl.BlockSpec((1, cp), lambda i: (0, 0)),        # bl
                pl.BlockSpec((fp, cp), lambda i: (0, 0)),       # Wr (bf16)
                pl.BlockSpec((1, cp), lambda i: (0, 0)),        # br
            ],
            out_specs=[
                pl.BlockSpec((TILE_N, cp), lambda i: (i, 0)),
                pl.BlockSpec((TILE_N, cp), lambda i: (i, 0)),
            ],
        ),
        compiler_params=pltpu.CompilerParams(
            dimension_semantics=("parallel",)),
    )(x, wl, bl, wr, br)


# --------------------------------------------------------------------------- #
# Flash-style GATv2 attention: tiled over (t_block, s_block), online softmax   #
# --------------------------------------------------------------------------- #
def _gatv2_attn_kernel(adj_ref, gr_ref, gl_ref, att_ref, bias_ref, o_ref,
                       m_sc, l_sc, acc_sc, *, apply_relu):
    si = pl.program_id(1)

    @pl.when(si == 0)
    def _():
        m_sc[...] = jnp.full(m_sc.shape, NEG_BIG, jnp.float32)
        l_sc[...] = jnp.zeros(l_sc.shape, jnp.float32)
        acc_sc[...] = jnp.zeros(acc_sc.shape, jnp.float32)

    gl = gl_ref[...]                                  # (Ts, C) source features
    gr = gr_ref[...]                                  # (Tt, C) target features
    att = att_ref[...]                                # (1, C)
    mask = adj_ref[...].astype(jnp.int32) > 0         # (Tt, Ts) adj[t, s] != 0

    # GATv2 logits: e[t, s] = att . leaky_relu(gl[s] + gr[t]); only (Tt,Ts,C) live.
    pair = gl[None, :, :] + gr[:, None, :]
    pair = jnp.where(pair > 0.0, pair, NEG_SLOPE * pair)
    e = jnp.sum(pair * att[None, :, :], axis=-1)      # (Tt, Ts)
    e = jnp.where(mask, e, NEG_BIG)

    # Online softmax over source blocks (running max / denom / accumulator).
    m_prev = m_sc[...]
    m_new = jnp.maximum(m_prev, jnp.max(e, axis=-1, keepdims=True))
    corr = jnp.exp(m_prev - m_new)
    p = jnp.where(mask, jnp.exp(e - m_new), 0.0)
    l_sc[...] = corr * l_sc[...] + jnp.sum(p, axis=-1, keepdims=True)
    acc_sc[...] = corr * acc_sc[...] + jnp.dot(
        p.astype(jnp.bfloat16), gl.astype(jnp.bfloat16),
        preferred_element_type=jnp.float32)
    m_sc[...] = m_new

    @pl.when(si == pl.num_programs(1) - 1)
    def _():
        out = acc_sc[...] * pl.reciprocal(l_sc[...], approx=True) + bias_ref[...]
        if apply_relu:
            out = jnp.maximum(out, 0.0)
        o_ref[...] = out


def gatv2_attention(adj_i8, gl, gr, att, bias, apply_relu):
    npad, cp = gl.shape
    kern = functools.partial(_gatv2_attn_kernel, apply_relu=apply_relu)
    return pl.pallas_call(
        kern,
        out_shape=jax.ShapeDtypeStruct((npad, cp), jnp.float32),
        grid_spec=pltpu.PrefetchScalarGridSpec(
            num_scalar_prefetch=0,
            grid=(npad // TILE_T, npad // TILE_S),
            in_specs=[
                pl.BlockSpec((TILE_T, TILE_S), lambda ti, si: (ti, si)),  # adj int8
                pl.BlockSpec((TILE_T, cp), lambda ti, si: (ti, 0)),       # gr (target)
                pl.BlockSpec((TILE_S, cp), lambda ti, si: (si, 0)),       # gl (source)
                pl.BlockSpec((1, cp), lambda ti, si: (0, 0)),             # att vector
                pl.BlockSpec((1, cp), lambda ti, si: (0, 0)),             # output bias
            ],
            out_specs=pl.BlockSpec((TILE_T, cp), lambda ti, si: (ti, 0)),
            scratch_shapes=[
                pltpu.VMEM((TILE_T, 1), jnp.float32),    # running max
                pltpu.VMEM((TILE_T, 1), jnp.float32),    # running denom
                pltpu.VMEM((TILE_T, cp), jnp.float32),   # running accumulator
            ],
        ),
        compiler_params=pltpu.CompilerParams(
            dimension_semantics=("parallel", "arbitrary"),
            vmem_limit_bytes=48 * 1024 * 1024),
    )(adj_i8, gr, gl, att, bias)


# --------------------------------------------------------------------------- #
# Full forward: GAT(v2=True), ReLU between layers, no activation after last    #
# --------------------------------------------------------------------------- #
def gat_standard_forward(init_embs, adjacency, layer_params, out_size):
    n, fin = init_embs.shape
    npad = _round_up(n, TILE_T)
    fp0 = _round_up(fin, LANE)

    # adj[t, s] = 1 iff edge s -> t; add_self_loops=True (GATv2Conv default).
    # Padded rows also get a self-loop so their softmax denominator is nonzero.
    adj = jnp.zeros((npad, npad), jnp.float32).at[:n, :n].set(adjacency)
    adj = jnp.maximum(adj, jnp.eye(npad, dtype=jnp.float32))
    adj_i8 = (adj > 0).astype(jnp.int8)

    h = jnp.zeros((npad, fp0), jnp.float32).at[:n, :fin].set(init_embs)

    num_layers = len(layer_params)
    for i, (wl, bl, wr, br, att, bias) in enumerate(layer_params):
        gl, gr = gatv2_project(h, wl, bl, wr, br)
        h = gatv2_attention(adj_i8, gl, gr, att, bias,
                            apply_relu=(i != num_layers - 1))
    # TODO(synk): for very small graphs, fusing all layers into one pallas_call would
    # also remove the per-layer launch + HBM round trip of the intermediate h.
    return h[:n, :out_size]


def _glorot(key, shape):
    fan_in, fan_out = shape
    limit = jnp.sqrt(6.0 / (fan_in + fan_out))
    return jax.random.uniform(key, shape, jnp.float32, -limit, limit)


def init_gat_params(key, in_size, hidden_size, num_layers, out_size):
    """Per-layer (Wl, bl, Wr, br, att, bias), zero-padded to lane-dense (128) shapes.
    Weights are stored in bf16 (MXU operands); biases / attention vector stay f32."""
    dims = [in_size] + [hidden_size] * (num_layers - 1) + [out_size]
    keys = jax.random.split(key, num_layers * 3)
    params = []
    for i in range(num_layers):
        fin, fout = dims[i], dims[i + 1]
        fp, cp = _round_up(fin, LANE), _round_up(fout, LANE)
        wl = _pad2(_glorot(keys[3 * i + 0], (fin, fout)), fp, cp).astype(jnp.bfloat16)
        wr = _pad2(_glorot(keys[3 * i + 1], (fin, fout)), fp, cp).astype(jnp.bfloat16)
        att = _pad2(_glorot(keys[3 * i + 2], (1, fout)), 1, cp)
        bl = jnp.zeros((1, cp), jnp.float32)
        br = jnp.zeros((1, cp), jnp.float32)
        bias = jnp.zeros((1, cp), jnp.float32)
        params.append((wl, bl, wr, br, att, bias))
    return params


if __name__ == "__main__":
    # GATstandard(in_size=16, hidden_size=32, num_layers=3, out_size=8, dropout=0.1)
    N, IN_SIZE, HIDDEN, NUM_LAYERS, OUT_SIZE = 64, 16, 32, 3, 8

    key = jax.random.PRNGKey(0)
    k_x, k_adj, k_p = jax.random.split(key, 3)

    init_embs = jax.random.normal(k_x, (N, IN_SIZE), jnp.float32)
    # Dense adjacency: adj[t, s] = 1 iff edge s -> t.
    adjacency = (jax.random.uniform(k_adj, (N, N)) < 0.15).astype(jnp.float32)

    layer_params = init_gat_params(k_p, IN_SIZE, HIDDEN, NUM_LAYERS, OUT_SIZE)

    out = gat_standard_forward(init_embs, adjacency, layer_params, OUT_SIZE)
    out = jax.block_until_ready(out)
    assert out.shape == (N, OUT_SIZE)
    assert bool(jnp.isfinite(out).all())
    print("KERNEL_OK")
</pallas_src>

<mosaic_0001>
module attributes {stable_mosaic.version = 11 : i64} {
  func.func @_project_kernel(%arg0: i32, %arg1: memref<128x128xf32, #tpu.memory_space<vmem>>, %arg2: memref<128x128xbf16, #tpu.memory_space<vmem>>, %arg3: memref<1x128xf32, #tpu.memory_space<vmem>>, %arg4: memref<128x128xbf16, #tpu.memory_space<vmem>>, %arg5: memref<1x128xf32, #tpu.memory_space<vmem>>, %arg6: memref<128x128xf32, #tpu.memory_space<vmem>>, %arg7: memref<128x128xf32, #tpu.memory_space<vmem>>) attributes {dimension_semantics = [#tpu.dimension_semantics<parallel>], iteration_bounds = array<i64: 1>, scalar_prefetch = 0 : i64, scratch_operands = 0 : i64, tpu.core_type = #tpu.core_type<tc>, window_params = [{transform_indices = @transform_0, window_bounds = array<i64: 128, 128>}, {pipeline_mode = #tpu.pipeline_mode<synchronous>, transform_indices = @transform_1, window_bounds = array<i64: 128, 128>}, {pipeline_mode = #tpu.pipeline_mode<synchronous>, transform_indices = @transform_2, window_bounds = array<i64: 1, 128>}, {pipeline_mode = #tpu.pipeline_mode<synchronous>, transform_indices = @transform_3, window_bounds = array<i64: 128, 128>}, {pipeline_mode = #tpu.pipeline_mode<synchronous>, transform_indices = @transform_4, window_bounds = array<i64: 1, 128>}, {transform_indices = @transform_5, window_bounds = array<i64: 128, 128>}, {transform_indices = @transform_6, window_bounds = array<i64: 128, 128>}]} {
    %c0 = arith.constant 0 : index
    %c0_0 = arith.constant 0 : index
    %0 = vector.load %arg1[%c0, %c0_0] : memref<128x128xf32, #tpu.memory_space<vmem>>, vector<128x128xf32>
    %1 = arith.truncf %0 : vector<128x128xf32> to vector<128x128xbf16>
    %c0_1 = arith.constant 0 : index
    %c0_2 = arith.constant 0 : index
    %2 = vector.load %arg2[%c0_1, %c0_2] : memref<128x128xbf16, #tpu.memory_space<vmem>>, vector<128x128xbf16>
    %cst = arith.constant dense<0.000000e+00> : vector<128x128xf32>
    %3 = tpu.matmul %1, %2, %cst {dimension_numbers = #tpu.dot_dimension_numbers<[1], [0], [0], [1], [0, 0, 1, 1], [], []>} : vector<128x128xbf16>, vector<128x128xbf16>, vector<128x128xf32> -> vector<128x128xf32>
    %c0_3 = arith.constant 0 : index
    %c0_4 = arith.constant 0 : index
    %4 = vector.load %arg3[%c0_3, %c0_4] : memref<1x128xf32, #tpu.memory_space<vmem>>, vector<1x128xf32>
    %5 = vector.broadcast %4 : vector<1x128xf32> to vector<128x128xf32>
    %6 = arith.addf %3, %5 : vector<128x128xf32>
    %c0_5 = arith.constant 0 : index
    %c0_6 = arith.constant 0 : index
    %7 = vector.load %arg6[%c0_5, %c0_6] : memref<128x128xf32, #tpu.memory_space<vmem>>, vector<128x128xf32>
    tpu.vector_store %arg6[%c0_5, %c0_6], %6 {strides = array<i32>} : memref<128x128xf32, #tpu.memory_space<vmem>>, vector<128x128xf32>,
    %c0_7 = arith.constant 0 : index
    %c0_8 = arith.constant 0 : index
    %8 = vector.load %arg4[%c0_7, %c0_8] : memref<128x128xbf16, #tpu.memory_space<vmem>>, vector<128x128xbf16>
    %cst_9 = arith.constant dense<0.000000e+00> : vector<128x128xf32>
    %9 = tpu.matmul %1, %8, %cst_9 {dimension_numbers = #tpu.dot_dimension_numbers<[1], [0], [0], [1], [0, 0, 1, 1], [], []>} : vector<128x128xbf16>, vector<128x128xbf16>, vector<128x128xf32> -> vector<128x128xf32>
    %c0_10 = arith.constant 0 : index
    %c0_11 = arith.constant 0 : index
    %10 = vector.load %arg5[%c0_10, %c0_11] : memref<1x128xf32, #tpu.memory_space<vmem>>, vector<1x128xf32>
    %11 = vector.broadcast %10 : vector<1x128xf32> to vector<128x128xf32>
    %12 = arith.addf %9, %11 : vector<128x128xf32>
    %c0_12 = arith.constant 0 : index
    %c0_13 = arith.constant 0 : index
    %13 = vector.load %arg7[%c0_12, %c0_13] : memref<128x128xf32, #tpu.memory_space<vmem>>, vector<128x128xf32>
    tpu.vector_store %arg7[%c0_12, %c0_13], %12 {strides = array<i32>} : memref<128x128xf32, #tpu.memory_space<vmem>>, vector<128x128xf32>,
    return
  }
  func.func @transform_0(%arg0: i32) -> (i32, i32) {
    %c0_i32 = arith.constant 0 : i32
    %c0_i32_0 = arith.constant 0 : i32
    return %arg0, %c0_i32 : i32, i32
  }
  func.func @transform_1(%arg0: i32) -> (i32, i32) {
    %c0_i32 = arith.constant 0 : i32
    %c0_i32_0 = arith.constant 0 : i32
    %c0_i32_1 = arith.constant 0 : i32
    return %c0_i32, %c0_i32_0 : i32, i32
  }
  func.func @transform_2(%arg0: i32) -> (i32, i32) {
    %c0_i32 = arith.constant 0 : i32
    %c0_i32_0 = arith.constant 0 : i32
    %c0_i32_1 = arith.constant 0 : i32
    return %c0_i32, %c0_i32_0 : i32, i32
  }
  func.func @transform_3(%arg0: i32) -> (i32, i32) {
    %c0_i32 = arith.constant 0 : i32
    %c0_i32_0 = arith.constant 0 : i32
    %c0_i32_1 = arith.constant 0 : i32
    return %c0_i32, %c0_i32_0 : i32, i32
  }
  func.func @transform_4(%arg0: i32) -> (i32, i32) {
    %c0_i32 = arith.constant 0 : i32
    %c0_i32_0 = arith.constant 0 : i32
    %c0_i32_1 = arith.constant 0 : i32
    return %c0_i32, %c0_i32_0 : i32, i32
  }
  func.func @transform_5(%arg0: i32) -> (i32, i32) {
    %c0_i32 = arith.constant 0 : i32
    %c0_i32_0 = arith.constant 0 : i32
    return %arg0, %c0_i32 : i32, i32
  }
  func.func @transform_6(%arg0: i32) -> (i32, i32) {
    %c0_i32 = arith.constant 0 : i32
    %c0_i32_0 = arith.constant 0 : i32
    return %arg0, %c0_i32 : i32, i32
  }
}

</mosaic_0001>

<bundles_post_ra>
// kernel: tpu_custom_call.1
= control target key start
LH: loop header
LB: loop body
LE: loop exit
PB: predicated region body
PF: predicated region fallthrough
CT: control target
= control target key end

     0   :  { %12 = vsyncpa [#allocation3], 0  ;;  %s917_s0 = inlined_call_operand.hbm [shape: f32[128,128], index: 0, kind: input, shape index: {}]   ;;  %s918_s1 = inlined_call_operand.hbm [shape: bf16[128,128], index: 1, kind: input, shape index: {}]   ;;  %s919_s2 = inlined_call_operand.vmem [shape: f32[1,128], index: 2, kind: input, shape index: {}]   ;;  %s920_s3 = inlined_call_operand.hbm [shape: bf16[128,128], index: 3, kind: input, shape index: {}]   ;;  %s921_s4 = inlined_call_operand.vmem [shape: f32[1,128], index: 4, kind: input, shape index: {}]   ;;  %s922_s5 = inlined_call_operand.hbm [shape: f32[128,128], index: 5, kind: output, shape index: {0}]   ;;  %s923_s6 = inlined_call_operand.hbm [shape: f32[128,128], index: 6, kind: output, shape index: {1}]  }
   0x1   :  { %13 = vsyncpa [#allocation6], 0 }
   0x2   :  { %14 = vsyncpa [#allocation4], 0 }
   0x3   :  { %15 = vsyncpa [#allocation10], 0  ;;  %s749_s21 = smov [#allocation5]   ;;  %s631_s25 = scalar_lea.hbm %s918_s1, 1024 }
   0x4   :  { %s33_s22 = sshll.u32 %s749_s21, 4  ;;  %p632_p0 = scmp.ne.s32.totalorder %s918_s1, %s631_s25  ;;  %s34_s22 = int_to_ptr.vmem [resolvable:$true] %s33_s22 }
   0x5   :  { %p635_p1 = scmp.lt.u32.totalorder %s631_s25, %s918_s1 }
   0x7   :  { %p637_p2 = pnand %p635_p1, %p632_p0 }
   0x9   :  { %640 = shalt.err (!%p637_p2)
}
   0xa   :  { %s641_s30 = scalar_lea.vmem %s34_s22, 1024  ;;  %p646_p4 = scmp.lt.s32.totalorder %s34_s22, %s34_s22 }
   0xb   :  { %p642_p3 = scmp.ne.s32.totalorder %s34_s22, %s641_s30  ;;  %p647_p5 = scmp.lt.s32.totalorder %s641_s30, %s641_s30 }
   0xd   :  { %p648_p6 = por %p647_p5, %p646_p4 }
   0xf   :  { %p649_p7 = pnand %p648_p6, %p642_p3 }
  0x11   :  { %652 = shalt.err (!%p649_p7)
}
  0x12   :  { %s750_s7 = smov 64   ;;  %s751_s8 = smov 4  }
  0x13   :  { %39 = dma.hbm_to_vmem [thread:$0]  %s918_s1, 1024, %s34_s22, [#allocation6], %s750_s7, %s750_s7, %s751_s8  }
  0x14   :  { %s752_s11 = smov [#allocation2]   ;;  %s653_s15 = scalar_lea.hbm %s917_s0, 2048 }
  0x15   :  { %s21_s12 = sshll.u32 %s752_s11, 4  ;;  %p654_p8 = scmp.ne.s32.totalorder %s917_s0, %s653_s15  ;;  %s22_s12 = int_to_ptr.vmem [resolvable:$true] %s21_s12 }
  0x16   :  { %p657_p9 = scmp.lt.u32.totalorder %s653_s15, %s917_s0 }
  0x18   :  { %p659_p10 = pnand %p657_p9, %p654_p8 }
  0x1a   :  { %662 = shalt.err (!%p659_p10)
}
  0x1b   :  { %s663_s20 = scalar_lea.vmem %s22_s12, 2048  ;;  %p668_p12 = scmp.lt.s32.totalorder %s22_s12, %s22_s12 }
  0x1c   :  { %p664_p11 = scmp.ne.s32.totalorder %s22_s12, %s663_s20  ;;  %p669_p13 = scmp.lt.s32.totalorder %s663_s20, %s663_s20 }
  0x1e   :  { %p670_p0 = por %p669_p13, %p668_p12 }
  0x20   :  { %p671_p1 = pnand %p670_p0, %p664_p11 }
  0x22   :  { %674 = shalt.err (!%p671_p1)
}
  0x23   :  { %s753_s1 = smov 128   ;;  %s754_s21 = smov 8  }
  0x24   :  { %27 = dma.hbm_to_vmem [thread:$0]  %s917_s0, 2048, %s22_s12, [#allocation3], %s753_s1, %s753_s1, %s754_s21  }
  0x25   :  { %s755_s24 = smov [#allocation7]   ;;  %s675_s28 = scalar_lea.hbm %s920_s3, 1024 }
  0x26   :  { %s47_s25 = sshll.u32 %s755_s24, 4  ;;  %p676_p2 = scmp.ne.s32.totalorder %s920_s3, %s675_s28  ;;  %s48_s25 = int_to_ptr.vmem [resolvable:$true] %s47_s25 }
  0x27   :  { %p679_p3 = scmp.lt.u32.totalorder %s675_s28, %s920_s3 }
  0x29   :  { %p681_p4 = pnand %p679_p3, %p676_p2 }
  0x2b   :  { %684 = shalt.err (!%p681_p4)
}
  0x2c   :  { %s685_s11 = scalar_lea.vmem %s48_s25, 1024  ;;  %p690_p6 = scmp.lt.s32.totalorder %s48_s25, %s48_s25 }
  0x2d   :  { %p686_p5 = scmp.ne.s32.totalorder %s48_s25, %s685_s11  ;;  %p691_p7 = scmp.lt.s32.totalorder %s685_s11, %s685_s11 }
  0x2f   :  { %p692_p8 = por %p691_p7, %p690_p6 }
  0x31   :  { %p693_p9 = pnand %p692_p8, %p686_p5 }
  0x33   :  { %696 = shalt.err (!%p693_p9)
}
  0x34   :  { %53 = dma.hbm_to_vmem [thread:$0]  %s920_s3, 1024, %s48_s25, [#allocation6], %s750_s7, %s750_s7, %s751_s8  }
  0x35   :  { %741 = dma.done.wait [#allocation3], 2048  }
  0x36   :  { %742 = vsyncadd [#allocation3], 4294965248 }
  0x37   :  { %743 = dma.done.wait [#allocation6], 2048  }
  0x38   :  { %744 = vsyncadd [#allocation6], 4294965248  ;;  %v615_v0 = vld [vmem:[#allocation5] sm:$0xff]   ;;  %v617_v2 = vld [vmem:[#allocation5 + $0x8] sm:$0xff]   ;;  %s757_s14 = smov [#allocation9]  }
  0x39   :  { %v616_v1 = vld [vmem:[#allocation7] sm:$0xff]   ;;  %542 = vmatprep.subr.bf16.mxu0 %v615_v0  ;;  %v618_v3 = vld [vmem:[#allocation7 + $0x8] sm:$0xff]   ;;  %v619_v4 = vld [vmem:[#allocation5 + $0x10] sm:$0xff]   ;;  %s475_s15 = sshll.u32 %s757_s14, 4  ;;  %s880_s15 = int_to_ptr.vmem [resolvable:$true] %s475_s15 }
  0x3a   :  { %574 = vmatprep.subr.bf16.mxu1 %v616_v1  ;;  %543 = vmatpush3.bf16.msra.mxu0 %v615_v0  ;;  %v620_v5 = vld [vmem:[#allocation7 + $0x10] sm:$0xff]   ;;  %v621_v6 = vld [vmem:[#allocation5 + $0x18] sm:$0xff]   ;;  %v623_v8 = vld [vmem:[#allocation5 + $0x20] sm:$0xff]  }
  0x3b   :  { %575 = vmatpush3.bf16.msra.mxu1 %v616_v1  ;;  %544 = vmatprep.subr.bf16.mxu0 %v617_v2  ;;  %v622_v7 = vld [vmem:[#allocation7 + $0x18] sm:$0xff]   ;;  %v624_v9 = vld [vmem:[#allocation7 + $0x20] sm:$0xff]   ;;  %v625_v10 = vld [vmem:[#allocation5 + $0x28] sm:$0xff]  }
  0x3c   :  { %576 = vmatprep.subr.bf16.mxu1 %v618_v3  ;;  %v66_v11 = vld [vmem:[#allocation2] sm:$0xff]  ;;  %v67_v12 = vld [vmem:[#allocation2 + $0x8] sm:$0xff]  ;;  %v627_v15 = vld [vmem:[#allocation5 + $0x30] sm:$0xff]  }
  0x3d   :  { %v626_v13 = vld [vmem:[#allocation7 + $0x28] sm:$0xff]   ;;  %v82_v14 = vpack.c.bf16 %v67_v12, %v66_v11  ;;  %v628_v16 = vld [vmem:[#allocation7 + $0x30] sm:$0xff]   ;;  %v629_v17 = vld [vmem:[#allocation5 + $0x38] sm:$0xff]  }
  0x3e   :  { %545 = vmatpush3.bf16.msra.mxu0 %v617_v2  ;;  %v630_v18 = vld [vmem:[#allocation7 + $0x38] sm:$0xff]   ;;  %v68_v19 = vld [vmem:[#allocation2 + $0x10] sm:$0xff]  ;;  %v70_v21 = vld [vmem:[#allocation2 + $0x20] sm:$0xff] }
  0x3f   :  { %577 = vmatpush3.bf16.msra.mxu1 %v618_v3  ;;  %546 = vmatprep.subr.bf16.mxu0 %v619_v4  ;;  %v69_v20 = vld [vmem:[#allocation2 + $0x18] sm:$0xff]  ;;  %v71_v22 = vld [vmem:[#allocation2 + $0x28] sm:$0xff]  ;;  %v72_v25 = vld [vmem:[#allocation2 + $0x30] sm:$0xff] }
  0x40   :  { %578 = vmatprep.subr.bf16.mxu1 %v620_v5  ;;  %558 = vmatprep.mubr.bf16.mxu0 %v82_v14  ;;  %v83_v23 = vpack.c.bf16 %v69_v20, %v68_v19  ;;  %v84_v24 = vpack.c.bf16 %v71_v22, %v70_v21  ;;  %v73_v26 = vld [vmem:[#allocation2 + $0x38] sm:$0xff]  ;;  %v74_v27 = vld [vmem:[#allocation2 + $0x40] sm:$0xff]  ;;  %v75_v28 = vld [vmem:[#allocation2 + $0x48] sm:$0xff] }
  0x41   :  { %590 = vmatprep.mubr.bf16.mxu1 %v82_v14  ;;  %v85_v29 = vpack.c.bf16 %v73_v26, %v72_v25  ;;  %v86_v30 = vpack.c.bf16 %v75_v28, %v74_v27  ;;  %v76_v31 = vld [vmem:[#allocation2 + $0x50] sm:$0xff]  ;;  %v77_v32 = vld [vmem:[#allocation2 + $0x58] sm:$0xff]  ;;  %v78_v33 = vld [vmem:[#allocation2 + $0x60] sm:$0xff] }
  0x42   :  { %547 = vmatpush3.bf16.msra.mxu0 %v619_v4  ;;  %v79_v34 = vld [vmem:[#allocation2 + $0x68] sm:$0xff]  ;;  %v87_v35 = vpack.c.bf16 %v77_v32, %v76_v31  ;;  %v80_v37 = vld [vmem:[#allocation2 + $0x70] sm:$0xff]  ;;  %v81_v38 = vld [vmem:[#allocation2 + $0x78] sm:$0xff] }
  0x43   :  { %579 = vmatpush3.bf16.msra.mxu1 %v620_v5  ;;  %548 = vmatprep.subr.bf16.mxu0 %v621_v6  ;;  %v88_v36 = vpack.c.bf16 %v79_v34, %v78_v33  ;;  %v89_v39 = vpack.c.bf16 %v81_v38, %v80_v37  ;;  %v841_v40 = vld [vmem:[%s919_s2] ss:$0 sm:$0xff]  ;;  %s756_s2 = smov [#allocation8]  }
  0x44   :  { %580 = vmatprep.subr.bf16.mxu1 %v622_v7  ;;  %v846_v41 = vld [vmem:[%s921_s4] ss:$0 sm:$0xff]  ;;  %s463_s4 = sshll.u32 %s756_s2, 4  ;;  %s464_s4 = int_to_ptr.vmem [resolvable:$true] %s463_s4 }
  0x45   :  { %s697_s16 = scalar_lea.vmem %s464_s4, 2048  ;;  %p702_p11 = scmp.lt.s32.totalorder %s464_s4, %s464_s4 }
  0x46   :  { %549 = vmatpush3.bf16.msra.mxu0 %v621_v6  ;;  %p698_p10 = scmp.ne.s32.totalorder %s464_s4, %s697_s16  ;;  %p703_p12 = scmp.lt.s32.totalorder %s697_s16, %s697_s16 }
  0x47   :  { %581 = vmatpush3.bf16.msra.mxu1 %v622_v7  ;;  %550 = vmatprep.subr.bf16.mxu0 %v623_v8 }
  0x48   :  { %582 = vmatprep.subr.bf16.mxu1 %v624_v9  ;;  %p704_p13 = por %p703_p12, %p702_p11 }
  0x4a   :  { %551 = vmatpush3.bf16.msra.mxu0 %v623_v8  ;;  %p705_p0 = pnand %p704_p13, %p698_p10 }
  0x4b   :  { %583 = vmatpush3.bf16.msra.mxu1 %v624_v9  ;;  %552 = vmatprep.subr.bf16.mxu0 %v625_v10 }
  0x4c   :  { %584 = vmatprep.subr.bf16.mxu1 %v626_v13 }
  0x4e   :  { %553 = vmatpush3.bf16.msra.mxu0 %v625_v10 }
  0x4f   :  { %585 = vmatpush3.bf16.msra.mxu1 %v626_v13  ;;  %554 = vmatprep.subr.bf16.mxu0 %v627_v15 }
  0x50   :  { %586 = vmatprep.subr.bf16.mxu1 %v628_v16 }
  0x52   :  { %555 = vmatpush3.bf16.msra.mxu0 %v627_v15 }
  0x53   :  { %587 = vmatpush3.bf16.msra.mxu1 %v628_v16  ;;  %556 = vmatprep.subr.bf16.mxu0 %v629_v17 }
  0x54   :  { %588 = vmatprep.subr.bf16.mxu1 %v630_v18 }
  0x56   :  { %557 = vmatpush3.bf16.msra.mxu0 %v629_v17 }
  0x57   :  { %589 = vmatpush3.bf16.msra.mxu1 %v630_v18 }
  0x59   :  { %559 = vmatmul.mubr.bf16.vlgmr.msra.gmra.mrb[0].mxu0 %v83_v23 }
  0x5a   :  { %591 = vmatmul.mubr.bf16.vlgmr.msra.gmra.mrb[0].mxu1 %v83_v23  ;;  %562 = vmatprep.mubr.bf16.mxu0 %v84_v24 }
  0x5b   :  { %594 = vmatprep.mubr.bf16.mxu1 %v84_v24 }
  0x61   :  { %563 = vmatmul.mubr.bf16.gmra.mrb[4].mxu0 %v85_v29 }
  0x62   :  { %595 = vmatmul.mubr.bf16.gmra.mrb[4].mxu1 %v85_v29  ;;  %566 = vmatprep.mubr.bf16.mxu0 %v86_v30 }
  0x63   :  { %598 = vmatprep.mubr.bf16.mxu1 %v86_v30 }
  0x69   :  { %567 = vmatmul.mubr.bf16.gmra.mrb[8].mxu0 %v87_v35 }
  0x6a   :  { %599 = vmatmul.mubr.bf16.gmra.mrb[8].mxu1 %v87_v35  ;;  %570 = vmatprep.mubr.bf16.mxu0 %v88_v36 }
  0x6b   :  { %602 = vmatprep.mubr.bf16.mxu1 %v88_v36 }
  0x71   :  { %571 = vmatmul.mubr.bf16.gmra.mrb[12].mxu0 %v89_v39 }
  0x72   :  { %603 = vmatmul.mubr.bf16.gmra.mrb[12].mxu1 %v89_v39 }
 0x12c   :  { %v560_v42 = vpop.f32.mrb[0].mxu0 }
 0x12d   :  { %v204_v43 = vadd.f32 %v560_v42, %v841_v40  ;;  %v592_v44 = vpop.f32.mrb[0].mxu1  ;;  %v195_v45 = vpop.f32.mrb[1].mxu0 }
 0x12e   :  { %v388_v46 = vadd.f32 %v592_v44, %v846_v41  ;;  %v196_v47 = vadd.f32 %v841_v40, %v195_v45  ;;  %v379_v48 = vpop.f32.mrb[1].mxu1  ;;  %v561_v49 = vpop.f32.mrb[2].mxu0 }
 0x12f   :  { %260 = vst [vmem:[#allocation8 + $0x10] sm:$0xff] %v204_v43  ;;  %v380_v50 = vadd.f32 %v846_v41, %v379_v48  ;;  %v207_v51 = vadd.f32 %v561_v49, %v841_v40  ;;  %v593_v52 = vpop.f32.mrb[2].mxu1  ;;  %v198_v53 = vpop.f32.mrb[3].mxu0 }
 0x130   :  { %444 = vst [vmem:[#allocation9 + $0x10] sm:$0xff] %v388_v46  ;;  %258 = vst [vmem:[#allocation8] sm:$0xff] %v196_v47  ;;  %v391_v54 = vadd.f32 %v593_v52, %v846_v41  ;;  %v199_v55 = vadd.f32 %v841_v40, %v198_v53  ;;  %v382_v56 = vpop.f32.mrb[3].mxu1 }
 0x131   :  { %442 = vst [vmem:[#allocation9] sm:$0xff] %v380_v50  ;;  %261 = vst [vmem:[#allocation8 + $0x18] sm:$0xff] %v207_v51  ;;  %v383_v57 = vadd.f32 %v846_v41, %v382_v56 }
 0x132   :  { %445 = vst [vmem:[#allocation9 + $0x18] sm:$0xff] %v391_v54  ;;  %259 = vst [vmem:[#allocation8 + $0x8] sm:$0xff] %v199_v55 }
 0x133   :  { %443 = vst [vmem:[#allocation9 + $0x8] sm:$0xff] %v383_v57 }
 0x134   :  { %v564_v58 = vpop.f32.mrb[4].mxu0 }
 0x135   :  { %v220_v59 = vadd.f32 %v564_v58, %v841_v40  ;;  %v596_v60 = vpop.f32.mrb[4].mxu1  ;;  %v211_v61 = vpop.f32.mrb[5].mxu0 }
 0x136   :  { %v404_v62 = vadd.f32 %v596_v60, %v846_v41  ;;  %v212_v63 = vadd.f32 %v841_v40, %v211_v61  ;;  %v395_v0 = vpop.f32.mrb[5].mxu1  ;;  %v565_v1 = vpop.f32.mrb[6].mxu0 }
 0x137   :  { %264 = vst [vmem:[#allocation8 + $0x30] sm:$0xff] %v220_v59  ;;  %v396_v2 = vadd.f32 %v846_v41, %v395_v0  ;;  %v223_v3 = vadd.f32 %v565_v1, %v841_v40  ;;  %v597_v4 = vpop.f32.mrb[6].mxu1  ;;  %v214_v5 = vpop.f32.mrb[7].mxu0 }
 0x138   :  { %448 = vst [vmem:[#allocation9 + $0x30] sm:$0xff] %v404_v62  ;;  %262 = vst [vmem:[#allocation8 + $0x20] sm:$0xff] %v212_v63  ;;  %v407_v6 = vadd.f32 %v597_v4, %v846_v41  ;;  %v215_v7 = vadd.f32 %v841_v40, %v214_v5  ;;  %v398_v8 = vpop.f32.mrb[7].mxu1 }
 0x139   :  { %446 = vst [vmem:[#allocation9 + $0x20] sm:$0xff] %v396_v2  ;;  %265 = vst [vmem:[#allocation8 + $0x38] sm:$0xff] %v223_v3  ;;  %v399_v9 = vadd.f32 %v846_v41, %v398_v8 }
 0x13a   :  { %449 = vst [vmem:[#allocation9 + $0x38] sm:$0xff] %v407_v6  ;;  %263 = vst [vmem:[#allocation8 + $0x28] sm:$0xff] %v215_v7 }
 0x13b   :  { %447 = vst [vmem:[#allocation9 + $0x28] sm:$0xff] %v399_v9 }
 0x13c   :  { %v568_v10 = vpop.f32.mrb[8].mxu0 }
 0x13d   :  { %v236_v11 = vadd.f32 %v568_v10, %v841_v40  ;;  %v600_v12 = vpop.f32.mrb[8].mxu1  ;;  %v227_v13 = vpop.f32.mrb[9].mxu0 }
 0x13e   :  { %v420_v14 = vadd.f32 %v600_v12, %v846_v41  ;;  %v228_v15 = vadd.f32 %v841_v40, %v227_v13  ;;  %v411_v16 = vpop.f32.mrb[9].mxu1  ;;  %v569_v17 = vpop.f32.mrb[10].mxu0 }
 0x13f   :  { %268 = vst [vmem:[#allocation8 + $0x50] sm:$0xff] %v236_v11  ;;  %v412_v18 = vadd.f32 %v846_v41, %v411_v16  ;;  %v239_v19 = vadd.f32 %v569_v17, %v841_v40  ;;  %v601_v20 = vpop.f32.mrb[10].mxu1  ;;  %v230_v21 = vpop.f32.mrb[11].mxu0 }
 0x140   :  { %452 = vst [vmem:[#allocation9 + $0x50] sm:$0xff] %v420_v14  ;;  %266 = vst [vmem:[#allocation8 + $0x40] sm:$0xff] %v228_v15  ;;  %v423_v22 = vadd.f32 %v601_v20, %v846_v41  ;;  %v231_v23 = vadd.f32 %v841_v40, %v230_v21  ;;  %v414_v24 = vpop.f32.mrb[11].mxu1 }
 0x141   :  { %450 = vst [vmem:[#allocation9 + $0x40] sm:$0xff] %v412_v18  ;;  %269 = vst [vmem:[#allocation8 + $0x58] sm:$0xff] %v239_v19  ;;  %v415_v25 = vadd.f32 %v846_v41, %v414_v24 }
 0x142   :  { %453 = vst [vmem:[#allocation9 + $0x58] sm:$0xff] %v423_v22  ;;  %267 = vst [vmem:[#allocation8 + $0x48] sm:$0xff] %v231_v23 }
 0x143   :  { %451 = vst [vmem:[#allocation9 + $0x48] sm:$0xff] %v415_v25 }
 0x144   :  { %v572_v26 = vpop.f32.mrb[12].mxu0 }
 0x145   :  { %v252_v27 = vadd.f32 %v572_v26, %v841_v40  ;;  %v604_v28 = vpop.f32.mrb[12].mxu1  ;;  %v243_v29 = vpop.f32.mrb[13].mxu0 }
 0x146   :  { %v436_v30 = vadd.f32 %v604_v28, %v846_v41  ;;  %v244_v31 = vadd.f32 %v841_v40, %v243_v29  ;;  %v427_v32 = vpop.f32.mrb[13].mxu1  ;;  %v573_v33 = vpop.f32.mrb[14].mxu0 }
 0x147   :  { %272 = vst [vmem:[#allocation8 + $0x70] sm:$0xff] %v252_v27  ;;  %v428_v34 = vadd.f32 %v846_v41, %v427_v32  ;;  %v255_v35 = vadd.f32 %v573_v33, %v841_v40  ;;  %v605_v36 = vpop.f32.mrb[14].mxu1  ;;  %v246_v37 = vpop.f32.mrb[15].mxu0 }
 0x148   :  { %456 = vst [vmem:[#allocation9 + $0x70] sm:$0xff] %v436_v30  ;;  %270 = vst [vmem:[#allocation8 + $0x60] sm:$0xff] %v244_v31  ;;  %v439_v38 = vadd.f32 %v605_v36, %v846_v41  ;;  %v247_v39 = vadd.f32 %v841_v40, %v246_v37  ;;  %v430_v42 = vpop.f32.mrb[15].mxu1 }
 0x149   :  { %454 = vst [vmem:[#allocation9 + $0x60] sm:$0xff] %v428_v34  ;;  %273 = vst [vmem:[#allocation8 + $0x78] sm:$0xff] %v255_v35  ;;  %v431_v43 = vadd.f32 %v846_v41, %v430_v42 }
 0x14a   :  { %457 = vst [vmem:[#allocation9 + $0x78] sm:$0xff] %v439_v38  ;;  %271 = vst [vmem:[#allocation8 + $0x68] sm:$0xff] %v247_v39 }
 0x14b   :  { %455 = vst [vmem:[#allocation9 + $0x68] sm:$0xff] %v431_v43 }
 0x14c   :  { %708 = shalt.err (!%p705_p0)
}
 0x14d   :  { %s709_s19 = scalar_lea.hbm %s922_s5, 2048 }
 0x14e   :  { %p710_p1 = scmp.ne.s32.totalorder %s922_s5, %s709_s19  ;;  %p713_p2 = scmp.lt.u32.totalorder %s709_s19, %s922_s5 }
 0x150   :  { %p715_p3 = pnand %p713_p2, %p710_p1 }
 0x152   :  { %718 = shalt.err (!%p715_p3)
}
 0x153   :  { %469 = dma.vmem_to_hbm [thread:$0]  %s464_s4, 2048, %s922_s5, [#allocation4], %s753_s1, %s753_s1, %s754_s21  }
 0x154   :  { %s719_s27 = scalar_lea.vmem %s880_s15, 2048  ;;  %p724_p5 = scmp.lt.s32.totalorder %s880_s15, %s880_s15 }
 0x155   :  { %p720_p4 = scmp.ne.s32.totalorder %s880_s15, %s719_s27  ;;  %p725_p6 = scmp.lt.s32.totalorder %s719_s27, %s719_s27 }
 0x157   :  { %p726_p7 = por %p725_p6, %p724_p5 }
 0x159   :  { %p727_p8 = pnand %p726_p7, %p720_p4 }
 0x15b   :  { %730 = shalt.err (!%p727_p8)
}
 0x15c   :  { %s731_s30 = scalar_lea.hbm %s923_s6, 2048 }
 0x15d   :  { %p732_p9 = scmp.ne.s32.totalorder %s923_s6, %s731_s30  ;;  %p735_p10 = scmp.lt.u32.totalorder %s731_s30, %s923_s6 }
 0x15f   :  { %p737_p11 = pnand %p735_p10, %p732_p9 }
 0x161   :  { %740 = shalt.err (!%p737_p11)
}
 0x162   :  { %481 = dma.vmem_to_hbm [thread:$0]  %s880_s15, 2048, %s923_s6, [#allocation10], %s753_s1, %s753_s1, %s754_s21  }
 0x163   :  { %745 = dma.done.wait [#allocation4], 2048  }
 0x164   :  { %746 = vsyncadd [#allocation4], 4294965248 }
 0x165   :  { %747 = dma.done.wait [#allocation10], 2048  }
 0x166   :  { %748 = vsyncadd [#allocation10], 4294965248 }
 0x167   :  { %488 = vsyncpa [#allocation3], 1 }
 0x168   :  { %489 = vsyncpa [#allocation6], 1 }
 0x169   :  { %490 = vsyncpa [#allocation4], 1 }
 0x16a   :  { %491 = vsyncpa [#allocation10], 1 }

</bundles_post_ra>
